<compile_context>
chip_gen: v5e
topology: v5e:2x2
jax: 0.10.0
libtpu: 0.0.40
codegen_flags: <defaults>
</compile_context>

<pallas_src>
import jax
import jax.numpy as jnp
import numpy as np
from jax import lax
from jax.experimental import pallas as pl
from jax.experimental.pallas import tpu as pltpu

# ---- problem sizes (small, consistent with the module) ----
N, CIN, H, W = 2, 4, 16, 16
COUT, K = 8, 3
PAD = 1
EPS = 1e-5

HP = H + 2 * PAD           # 18 : padded rows per batch element (height padding only)
ROW = W * CIN              # 64 : one input row with (w, ci) flattened onto lanes
OROW = W * COUT            # 128: one output row with (w, co) flattened onto lanes (lane-dense)


def conv_bn_relu_kernel(x_ref, w_ref, b_ref, o_ref):
    # x_ref: (N*HP, ROW)  = (36, 64)   height-padded input rows, (w, ci) on lanes
    # w_ref: (K, ROW, OROW) = (3, 64, 128)  banded, BN-scale-folded weights per kh
    # b_ref: (1, OROW)    = (1, 128)   folded BN bias, tiled across w
    # o_ref: (N*H, OROW)  = (32, 128)  lane-dense output rows
    bias = b_ref[...]                                        # (1, 128)
    for n in range(N):                                       # N=2, fully unrolled
        acc = jnp.zeros((H, OROW), dtype=jnp.float32)        # (16, 128) -> 2 vregs
        base = n * HP
        for kh in range(K):
            xs = x_ref[base + kh: base + kh + H, :]          # (16, 64) static 2-D slice
            acc = acc + jnp.dot(xs, w_ref[kh],               # single MXU push each
                                preferred_element_type=jnp.float32)
        y = jnp.maximum(acc + bias, 0.0)                     # fused BN bias + ReLU
        o_ref[n * H:(n + 1) * H, :] = y.astype(o_ref.dtype)  # full-lane (128-wide) store


def _fold_params(weight_oihw, gamma, beta, run_mean, run_var):
    """Fold BN into the conv weights and build the banded per-kh weight matrices."""
    scale = gamma / jnp.sqrt(run_var + EPS)                  # (COUT,)
    bias = beta - run_mean * scale                           # (COUT,)
    # OIHW -> (kh, kw, ci, co), BN scale folded in (conv is linear in W).
    w_f = jnp.transpose(weight_oihw, (2, 3, 1, 0)) * scale[None, None, None, :]
    # Banded matrices encoding the width-direction zero padding:
    #   w_band[kh, wi*CIN+ci, w*COUT+co] = w_f[kh, wi-w+PAD, ci, co] if 0 <= wi-w+PAD < K else 0
    kw_i = np.arange(K)[:, None, None]
    wi_i = np.arange(W)[None, :, None]
    w_i = np.arange(W)[None, None, :]
    sel = jnp.asarray((wi_i == w_i + kw_i - PAD).astype(np.float32))     # (K, W, W) constant
    w_band = jnp.einsum("xab,kxio->kaibo", sel, w_f).reshape(K, ROW, OROW)
    bias_row = jnp.tile(bias, W).reshape(1, OROW)            # (1, 128): bias[co] at w*COUT+co
    return w_band.astype(jnp.float32), bias_row.astype(jnp.float32)


@jax.jit
def conv_module_forward(x_nchw, weight_oihw, gamma, beta, run_mean, run_var):
    """Forward of Conv(conv2d(4->8, k=3, p=1, bias=None), bn=BatchNorm2d(8), act=ReLU)."""
    w_band, bias_row = _fold_params(weight_oihw, gamma, beta, run_mean, run_var)

    # NCHW -> NHWC, pad height only (width padding lives in w_band), flatten (w, ci) to lanes.
    # These three ops fuse into a single XLA data-movement fusion on a 4 KB tensor.
    x_nhwc = jnp.transpose(x_nchw, (0, 2, 3, 1))
    x_padh = jnp.pad(x_nhwc, ((0, 0), (PAD, PAD), (0, 0), (0, 0)))
    x2 = x_padh.reshape(N * HP, ROW)                         # (36, 64)

    out2 = pl.pallas_call(
        conv_bn_relu_kernel,
        out_shape=jax.ShapeDtypeStruct((N * H, OROW), jnp.float32),
        grid_spec=pltpu.PrefetchScalarGridSpec(
            num_scalar_prefetch=0,
            grid=(1,),                                       # collapsed grid: one step
            in_specs=[
                pl.BlockSpec((N * HP, ROW), lambda i: (0, 0)),
                pl.BlockSpec((K, ROW, OROW), lambda i: (0, 0, 0)),
                pl.BlockSpec((1, OROW), lambda i: (0, 0)),
            ],
            out_specs=pl.BlockSpec((N * H, OROW), lambda i: (0, 0)),
        ),
        compiler_params=pltpu.CompilerParams(
            dimension_semantics=("arbitrary",)),
    )(x2, w_band, bias_row)

    out_nhwc = out2.reshape(N, H, W, COUT)                   # lane-dense -> NHWC
    return jnp.transpose(out_nhwc, (0, 3, 1, 2))             # NHWC -> NCHW


def reference_forward(x_nchw, weight_oihw, gamma, beta, run_mean, run_var):
    """Pure-JAX reference (lax conv) for a correctness sanity check."""
    y = lax.conv_general_dilated(
        x_nchw, weight_oihw, window_strides=(1, 1),
        padding=((PAD, PAD), (PAD, PAD)),
        dimension_numbers=("NCHW", "OIHW", "NCHW"))
    scale = gamma / jnp.sqrt(run_var + EPS)
    bias = beta - run_mean * scale
    y = y * scale[None, :, None, None] + bias[None, :, None, None]
    return jnp.maximum(y, 0.0)


if __name__ == "__main__":
    key = jax.random.PRNGKey(0)
    k_x, k_w, k_g, k_b, k_m, k_v = jax.random.split(key, 6)

    # Deterministic parameter init (shapes from nn.Conv2d(4, 8, 3) / nn.BatchNorm2d(8)).
    x = jax.random.normal(k_x, (N, CIN, H, W), dtype=jnp.float32)
    weight = jax.random.normal(k_w, (COUT, CIN, K, K), dtype=jnp.float32) * 0.1
    gamma = 1.0 + 0.1 * jax.random.normal(k_g, (COUT,), dtype=jnp.float32)
    beta = 0.1 * jax.random.normal(k_b, (COUT,), dtype=jnp.float32)
    run_mean = 0.1 * jax.random.normal(k_m, (COUT,), dtype=jnp.float32)
    run_var = jnp.abs(jax.random.normal(k_v, (COUT,), dtype=jnp.float32)) + 0.5

    out = conv_module_forward(x, weight, gamma, beta, run_mean, run_var)
    out = jax.block_until_ready(out)

    ref = reference_forward(x, weight, gamma, beta, run_mean, run_var)
    assert out.shape == (N, COUT, H, W)
    assert jnp.allclose(out, ref, atol=1e-3, rtol=1e-3)

    print("KERNEL_OK")
</pallas_src>

<mosaic_0001>
module attributes {stable_mosaic.version = 11 : i64} {
  func.func @conv_bn_relu_kernel(%arg0: i32, %arg1: memref<36x64xf32, #tpu.memory_space<vmem>>, %arg2: memref<3x64x128xf32, #tpu.memory_space<vmem>>, %arg3: memref<1x128xf32, #tpu.memory_space<vmem>>, %arg4: memref<32x128xf32, #tpu.memory_space<vmem>>) attributes {dimension_semantics = [#tpu.dimension_semantics<arbitrary>], iteration_bounds = array<i64: 1>, scalar_prefetch = 0 : i64, scratch_operands = 0 : i64, tpu.core_type = #tpu.core_type<tc>, window_params = [{pipeline_mode = #tpu.pipeline_mode<synchronous>, transform_indices = @transform_0, window_bounds = array<i64: 36, 64>}, {pipeline_mode = #tpu.pipeline_mode<synchronous>, transform_indices = @transform_1, window_bounds = array<i64: 3, 64, 128>}, {pipeline_mode = #tpu.pipeline_mode<synchronous>, transform_indices = @transform_2, window_bounds = array<i64: 1, 128>}, {pipeline_mode = #tpu.pipeline_mode<synchronous>, transform_indices = @transform_3, window_bounds = array<i64: 32, 128>}]} {
    %c0 = arith.constant 0 : index
    %c0_0 = arith.constant 0 : index
    %0 = vector.load %arg3[%c0, %c0_0] : memref<1x128xf32, #tpu.memory_space<vmem>>, vector<1x128xf32>
    %cst = arith.constant 0.000000e+00 : f32
    %1 = vector.broadcast %cst : f32 to vector<16x128xf32>
    %c0_1 = arith.constant 0 : index
    %c0_2 = arith.constant 0 : index
    %2 = vector.load %arg1[%c0_1, %c0_2] : memref<36x64xf32, #tpu.memory_space<vmem>>, vector<16x64xf32>
    %c0_3 = arith.constant 0 : index
    %c0_4 = arith.constant 0 : index
    %c0_5 = arith.constant 0 : index
    %3 = vector.load %arg2[%c0_3, %c0_4, %c0_5] : memref<3x64x128xf32, #tpu.memory_space<vmem>>, vector<1x64x128xf32>
    %4 = vector.shape_cast %3 : vector<1x64x128xf32> to vector<64x128xf32>
    %cst_6 = arith.constant dense<0.000000e+00> : vector<16x128xf32>
    %5 = tpu.matmul %2, %4, %cst_6 {dimension_numbers = #tpu.dot_dimension_numbers<[1], [0], [0], [1], [0, 0, 1, 1], [], []>} : vector<16x64xf32>, vector<64x128xf32>, vector<16x128xf32> -> vector<16x128xf32>
    %6 = arith.addf %1, %5 : vector<16x128xf32>
    %c1 = arith.constant 1 : index
    %c0_7 = arith.constant 0 : index
    %7 = vector.load %arg1[%c1, %c0_7] : memref<36x64xf32, #tpu.memory_space<vmem>>, vector<16x64xf32>
    %c1_8 = arith.constant 1 : index
    %c0_9 = arith.constant 0 : index
    %c0_10 = arith.constant 0 : index
    %8 = vector.load %arg2[%c1_8, %c0_9, %c0_10] : memref<3x64x128xf32, #tpu.memory_space<vmem>>, vector<1x64x128xf32>
    %9 = vector.shape_cast %8 : vector<1x64x128xf32> to vector<64x128xf32>
    %cst_11 = arith.constant dense<0.000000e+00> : vector<16x128xf32>
    %10 = tpu.matmul %7, %9, %cst_11 {dimension_numbers = #tpu.dot_dimension_numbers<[1], [0], [0], [1], [0, 0, 1, 1], [], []>} : vector<16x64xf32>, vector<64x128xf32>, vector<16x128xf32> -> vector<16x128xf32>
    %11 = arith.addf %6, %10 : vector<16x128xf32>
    %c2 = arith.constant 2 : index
    %c0_12 = arith.constant 0 : index
    %12 = vector.load %arg1[%c2, %c0_12] : memref<36x64xf32, #tpu.memory_space<vmem>>, vector<16x64xf32>
    %c2_13 = arith.constant 2 : index
    %c0_14 = arith.constant 0 : index
    %c0_15 = arith.constant 0 : index
    %13 = vector.load %arg2[%c2_13, %c0_14, %c0_15] : memref<3x64x128xf32, #tpu.memory_space<vmem>>, vector<1x64x128xf32>
    %14 = vector.shape_cast %13 : vector<1x64x128xf32> to vector<64x128xf32>
    %cst_16 = arith.constant dense<0.000000e+00> : vector<16x128xf32>
    %15 = tpu.matmul %12, %14, %cst_16 {dimension_numbers = #tpu.dot_dimension_numbers<[1], [0], [0], [1], [0, 0, 1, 1], [], []>} : vector<16x64xf32>, vector<64x128xf32>, vector<16x128xf32> -> vector<16x128xf32>
    %16 = arith.addf %11, %15 : vector<16x128xf32>
    %17 = vector.broadcast %0 : vector<1x128xf32> to vector<16x128xf32>
    %18 = arith.addf %16, %17 : vector<16x128xf32>
    %cst_17 = arith.constant 0.000000e+00 : f32
    %19 = vector.broadcast %cst_17 : f32 to vector<16x128xf32>
    %20 = arith.maximumf %18, %19 : vector<16x128xf32>
    %c0_18 = arith.constant 0 : index
    %c0_19 = arith.constant 0 : index
    %21 = vector.load %arg4[%c0_18, %c0_19] : memref<32x128xf32, #tpu.memory_space<vmem>>, vector<16x128xf32>
    tpu.vector_store %arg4[%c0_18, %c0_19], %20 {strides = array<i32>} : memref<32x128xf32, #tpu.memory_space<vmem>>, vector<16x128xf32>,
    %cst_20 = arith.constant 0.000000e+00 : f32
    %22 = vector.broadcast %cst_20 : f32 to vector<16x128xf32>
    %c18 = arith.constant 18 : index
    %c0_21 = arith.constant 0 : index
    %23 = vector.load %arg1[%c18, %c0_21] : memref<36x64xf32, #tpu.memory_space<vmem>>, vector<16x64xf32>
    %c0_22 = arith.constant 0 : index
    %c0_23 = arith.constant 0 : index
    %c0_24 = arith.constant 0 : index
    %24 = vector.load %arg2[%c0_22, %c0_23, %c0_24] : memref<3x64x128xf32, #tpu.memory_space<vmem>>, vector<1x64x128xf32>
    %25 = vector.shape_cast %24 : vector<1x64x128xf32> to vector<64x128xf32>
    %cst_25 = arith.constant dense<0.000000e+00> : vector<16x128xf32>
    %26 = tpu.matmul %23, %25, %cst_25 {dimension_numbers = #tpu.dot_dimension_numbers<[1], [0], [0], [1], [0, 0, 1, 1], [], []>} : vector<16x64xf32>, vector<64x128xf32>, vector<16x128xf32> -> vector<16x128xf32>
    %27 = arith.addf %22, %26 : vector<16x128xf32>
    %c19 = arith.constant 19 : index
    %c0_26 = arith.constant 0 : index
    %28 = vector.load %arg1[%c19, %c0_26] : memref<36x64xf32, #tpu.memory_space<vmem>>, vector<16x64xf32>
    %c1_27 = arith.constant 1 : index
    %c0_28 = arith.constant 0 : index
    %c0_29 = arith.constant 0 : index
    %29 = vector.load %arg2[%c1_27, %c0_28, %c0_29] : memref<3x64x128xf32, #tpu.memory_space<vmem>>, vector<1x64x128xf32>
    %30 = vector.shape_cast %29 : vector<1x64x128xf32> to vector<64x128xf32>
    %cst_30 = arith.constant dense<0.000000e+00> : vector<16x128xf32>
    %31 = tpu.matmul %28, %30, %cst_30 {dimension_numbers = #tpu.dot_dimension_numbers<[1], [0], [0], [1], [0, 0, 1, 1], [], []>} : vector<16x64xf32>, vector<64x128xf32>, vector<16x128xf32> -> vector<16x128xf32>
    %32 = arith.addf %27, %31 : vector<16x128xf32>
    %c20 = arith.constant 20 : index
    %c0_31 = arith.constant 0 : index
    %33 = vector.load %arg1[%c20, %c0_31] : memref<36x64xf32, #tpu.memory_space<vmem>>, vector<16x64xf32>
    %c2_32 = arith.constant 2 : index
    %c0_33 = arith.constant 0 : index
    %c0_34 = arith.constant 0 : index
    %34 = vector.load %arg2[%c2_32, %c0_33, %c0_34] : memref<3x64x128xf32, #tpu.memory_space<vmem>>, vector<1x64x128xf32>
    %35 = vector.shape_cast %34 : vector<1x64x128xf32> to vector<64x128xf32>
    %cst_35 = arith.constant dense<0.000000e+00> : vector<16x128xf32>
    %36 = tpu.matmul %33, %35, %cst_35 {dimension_numbers = #tpu.dot_dimension_numbers<[1], [0], [0], [1], [0, 0, 1, 1], [], []>} : vector<16x64xf32>, vector<64x128xf32>, vector<16x128xf32> -> vector<16x128xf32>
    %37 = arith.addf %32, %36 : vector<16x128xf32>
    %38 = vector.broadcast %0 : vector<1x128xf32> to vector<16x128xf32>
    %39 = arith.addf %37, %38 : vector<16x128xf32>
    %cst_36 = arith.constant 0.000000e+00 : f32
    %40 = vector.broadcast %cst_36 : f32 to vector<16x128xf32>
    %41 = arith.maximumf %39, %40 : vector<16x128xf32>
    %c16 = arith.constant 16 : index
    %c0_37 = arith.constant 0 : index
    %42 = vector.load %arg4[%c16, %c0_37] : memref<32x128xf32, #tpu.memory_space<vmem>>, vector<16x128xf32>
    tpu.vector_store %arg4[%c16, %c0_37], %41 {strides = array<i32>} : memref<32x128xf32, #tpu.memory_space<vmem>>, vector<16x128xf32>,
    return
  }
  func.func @transform_0(%arg0: i32) -> (i32, i32) {
    %c0_i32 = arith.constant 0 : i32
    %c0_i32_0 = arith.constant 0 : i32
    %c0_i32_1 = arith.constant 0 : i32
    return %c0_i32, %c0_i32_0 : i32, i32
  }
  func.func @transform_1(%arg0: i32) -> (i32, i32, i32) {
    %c0_i32 = arith.constant 0 : i32
    %c0_i32_0 = arith.constant 0 : i32
    %c0_i32_1 = arith.constant 0 : i32
    %c0_i32_2 = arith.constant 0 : i32
    return %c0_i32, %c0_i32_0, %c0_i32_1 : i32, i32, i32
  }
  func.func @transform_2(%arg0: i32) -> (i32, i32) {
    %c0_i32 = arith.constant 0 : i32
    %c0_i32_0 = arith.constant 0 : i32
    %c0_i32_1 = arith.constant 0 : i32
    return %c0_i32, %c0_i32_0 : i32, i32
  }
  func.func @transform_3(%arg0: i32) -> (i32, i32) {
    %c0_i32 = arith.constant 0 : i32
    %c0_i32_0 = arith.constant 0 : i32
    %c0_i32_1 = arith.constant 0 : i32
    return %c0_i32, %c0_i32_0 : i32, i32
  }
}

</mosaic_0001>

<bundles_post_ra>
// kernel: tile.8
= control target key start
LH: loop header
LB: loop body
LE: loop exit
PB: predicated region body
PF: predicated region fallthrough
CT: control target
= control target key end

     0   :  { %s28_s0 = inlined_call_operand.vmem [shape: f32[8], index: 0, kind: input, shape index: {}]   ;;  %s29_s1 = inlined_call_operand.vmem [shape: f32[16,8], index: 1, kind: output, shape index: {}]  }
   0x1   :  { %v4_v0 = vld [vmem:[%s28_s0] ss:$0 sm:$0xff] }
   0x2   :  { %5 = vst [vmem:[%s29_s1] sm:$0xff] %v4_v0 }
   0x3   :  { %8 = vst [vmem:[%s29_s1 + $0x8] sm:$0xff] %v4_v0 }

// kernel: tile.9
= control target key start
LH: loop header
LB: loop body
LE: loop exit
PB: predicated region body
PF: predicated region fallthrough
CT: control target
= control target key end

     0   :  { %s131_s10 = smov 120   ;;  %s132_s11 = smov 104   ;;  %vm3_vm0 = vcmask 64512   ;;  %vm9_vm1 = vcmask 1048512   ;;  %vm15_vm2 = vcmask 982912   ;;  %vm21_vm3 = vcmask 917312   ;;  %s207_s0 = inlined_call_operand.vmem [shape: f32[16,8], index: 0, kind: input, shape index: {}]   ;;  %s208_s1 = inlined_call_operand.vmem [shape: f32[1,128], index: 1, kind: output, shape index: {}]  }
   0x1   :  { %v101_v0 = vld [vmem:[%s207_s0 + $0xf] sm:$0x1]   ;;  %v103_v1 = vld [vmem:[%s207_s0 + $0xd] sm:$0x1]   ;;  %v105_v2 = vld [vmem:[%s207_s0 + $0xb] sm:$0x1]  }
   0x2   :  { %7 = vrot.lane.b32.xlu0 %v101_v0, %s131_s10  ;;  %19 = vrot.lane.b32.xlu1 %v103_v1, %s132_s11  ;;  %s133_s14 = smov 88   ;;  %v102_v3 = vld [vmem:[%s207_s0 + $0xe] sm:$0x1]   ;;  %v104_v4 = vld [vmem:[%s207_s0 + $0xc] sm:$0x1]   ;;  %s134_s19 = smov 112  }
   0x3   :  { %31 = vrot.lane.b32.xlu2 %v105_v2, %s133_s14  ;;  %s135_s20 = smov 96   ;;  %v106_v5 = vld [vmem:[%s207_s0 + $0xa] sm:$0x1]   ;;  %s136_s23 = smov 80   ;;  %v107_v6 = vld [vmem:[%s207_s0 + $0x9] sm:$0x1]  }
   0x4   :  { %v108_v7 = vld [vmem:[%s207_s0 + $0x8] sm:$0x1]   ;;  %s137_s28 = smov 72   ;;  %s138_s29 = smov 64   ;;  %v109_v8 = vld [vmem:[%s207_s0 + $0x7] sm:$0x1]  }
   0x5   :  { %s139_s3 = smov 56   ;;  %v110_v9 = vld [vmem:[%s207_s0 + $0x6] sm:$0x1]   ;;  %v111_v10 = vld [vmem:[%s207_s0 + $0x5] sm:$0x1]   ;;  %s140_s8 = smov 48  }
   0x6   :  { %s141_s9 = smov 40   ;;  %v112_v11 = vld [vmem:[%s207_s0 + $0x4] sm:$0x1]   ;;  %s142_s12 = smov 32   ;;  %v113_v12 = vld [vmem:[%s207_s0 + $0x3] sm:$0x1]  }
   0x7   :  { %v114_v13 = vld [vmem:[%s207_s0 + $0x2] sm:$0x1]   ;;  %s143_s17 = smov 24   ;;  %s144_s18 = smov 16   ;;  %v115_v14 = vld [vmem:[%s207_s0 + $0x1] sm:$0x1]  }
   0x8   :  { %s145_s21 = smov 8   ;;  %v2_v15 = vld [vmem:[%s207_s0] sm:$0x1]   ;;  %vm27_vm4 = vcmask 851712   ;;  %vm33_vm5 = vcmask 786112   ;;  %vm39_vm6 = vcmask 720512  }
   0x9   :  { %4 = vst.msk [vmem:[#allocation0] sm:$0x1] %vm3_vm0, %v2_v15   ;;  %vm45_vm7 = vcmask 654912   ;;  %vm51_vm8 = vcmask 589312   ;;  %vm57_vm9 = vcmask 523712   ;;  %vm63_vm10 = vcmask 458112  }
   0xa   :  { %13 = vrot.lane.b32.xlu0 %v102_v3, %s134_s19  ;;  %25 = vrot.lane.b32.xlu1 %v104_v4, %s135_s20  ;;  %vm69_vm11 = vcmask 392512   ;;  %vm75_vm12 = vcmask 326912   ;;  %vm81_vm13 = vcmask 261312   ;;  %vm87_vm14 = vcmask 195712  }
   0xb   :  { %37 = vrot.lane.b32.xlu2 %v106_v5, %s136_s23  ;;  %vm93_vm15 = vcmask 130112  }
  0x12   :  { %43 = vrot.lane.b32.xlu0 %v107_v6, %s137_s28  ;;  %49 = vrot.lane.b32.xlu1 %v108_v7, %s138_s29 }
  0x13   :  { %55 = vrot.lane.b32.xlu2 %v109_v8, %s139_s3 }
  0x1a   :  { %61 = vrot.lane.b32.xlu0 %v110_v9, %s140_s8  ;;  %67 = vrot.lane.b32.xlu1 %v111_v10, %s141_s9 }
  0x1b   :  { %73 = vrot.lane.b32.xlu2 %v112_v11, %s142_s12 }
  0x22   :  { %79 = vrot.lane.b32.xlu0 %v113_v12, %s143_s17  ;;  %85 = vrot.lane.b32.xlu1 %v114_v13, %s144_s18 }
  0x23   :  { %91 = vrot.lane.b32.xlu2 %v115_v14, %s145_s21 }
  0x5d   :  { %v32_v16 = vpop.permute.xlu2 %31  }
  0x65   :  { %v38_v17 = vpop.permute.xlu2 %37  }
  0x6d   :  { %v56_v18 = vpop.permute.xlu2 %55  }
  0x74   :  { %v8_v19 = vpop.permute.xlu0 %7   ;;  %v20_v20 = vpop.permute.xlu1 %19  }
  0x75   :  { %10 = vst.msk [vmem:[#allocation0] sm:$0x1] %vm9_vm1, %v8_v19   ;;  %v74_v21 = vpop.permute.xlu2 %73  }
  0x7c   :  { %v14_v22 = vpop.permute.xlu0 %13   ;;  %v26_v23 = vpop.permute.xlu1 %25  }
  0x7d   :  { %16 = vst.msk [vmem:[#allocation0] sm:$0x1] %vm15_vm2, %v14_v22   ;;  %v92_v24 = vpop.permute.xlu2 %91  }
  0x7e   :  { %22 = vst.msk [vmem:[#allocation0] sm:$0x1] %vm21_vm3, %v20_v20  }
  0x7f   :  { %28 = vst.msk [vmem:[#allocation0] sm:$0x1] %vm27_vm4, %v26_v23  }
  0x80   :  { %34 = vst.msk [vmem:[#allocation0] sm:$0x1] %vm33_vm5, %v32_v16  }
  0x81   :  { %40 = vst.msk [vmem:[#allocation0] sm:$0x1] %vm39_vm6, %v38_v17  }
  0x84   :  { %v44_v25 = vpop.permute.xlu0 %43   ;;  %v50_v26 = vpop.permute.xlu1 %49  }
  0x85   :  { %46 = vst.msk [vmem:[#allocation0] sm:$0x1] %vm45_vm7, %v44_v25  }
  0x86   :  { %52 = vst.msk [vmem:[#allocation0] sm:$0x1] %vm51_vm8, %v50_v26  }
  0x87   :  { %58 = vst.msk [vmem:[#allocation0] sm:$0x1] %vm57_vm9, %v56_v18  }
  0x8c   :  { %v62_v27 = vpop.permute.xlu0 %61   ;;  %v68_v28 = vpop.permute.xlu1 %67  }
  0x8d   :  { %64 = vst.msk [vmem:[#allocation0] sm:$0x1] %vm63_vm10, %v62_v27  }
  0x8e   :  { %70 = vst.msk [vmem:[#allocation0] sm:$0x1] %vm69_vm11, %v68_v28  }
  0x8f   :  { %76 = vst.msk [vmem:[#allocation0] sm:$0x1] %vm75_vm12, %v74_v21  }
  0x94   :  { %v80_v29 = vpop.permute.xlu0 %79   ;;  %v86_v30 = vpop.permute.xlu1 %85  }
  0x95   :  { %82 = vst.msk [vmem:[#allocation0] sm:$0x1] %vm81_vm13, %v80_v29  }
  0x96   :  { %88 = vst.msk [vmem:[#allocation0] sm:$0x1] %vm87_vm14, %v86_v30  }
  0x97   :  { %94 = vst.msk [vmem:[#allocation0] sm:$0x1] %vm93_vm15, %v92_v24  }
  0x9e   :  { %v97_v31 = vld [vmem:[#allocation0] sm:$0x1] }
  0x9f   :  { %100 = vst [vmem:[%s208_s1] sm:$0x1] %v97_v31 }

// kernel: conv_module_forward.1
= control target key start
LH: loop header
LB: loop body
LE: loop exit
PB: predicated region body
PF: predicated region fallthrough
CT: control target
= control target key end

     0   :  { %vm36_vm0 = vcmask 523264   ;;  %s531_s1 = inlined_call_operand.vmem [shape: f32[3,64,128], index: 1, kind: input, shape index: {}]   ;;  %s532_s0 = inlined_call_operand.vmem [shape: f32[36,64], index: 0, kind: input, shape index: {}]   ;;  %s533_s2 = inlined_call_operand.vmem [shape: f32[1,128], index: 2, kind: input, shape index: {}]   ;;  %s534_s3 = inlined_call_operand.vmem [shape: f32[32,128], index: 3, kind: output, shape index: {}]  }
   0x1   :  { %v282_v0 = vld [vmem:[%s531_s1 + $0x78] sm:$0xff]  ;;  %v281_v2 = vld [vmem:[%s531_s1 + $0x70] sm:$0xff]  ;;  %v280_v5 = vld [vmem:[%s531_s1 + $0x68] sm:$0xff] }
   0x2   :  { %v362_v1 = vld [vmem:[%s531_s1 + $0xb8] sm:$0xff]  ;;  %51 = vmatpush.msra.mxu0 %v282_v0  ;;  %v374_v4 = vld [vmem:[%s531_s1 + $0xb0] sm:$0xff]  ;;  %180 = vmatpush.msra.mxu3 %v282_v0  ;;  %v385_v7 = vld [vmem:[%s531_s1 + $0xa8] sm:$0xff] }
   0x3   :  { %120 = vmatpush.msra.mxu2 %v362_v1  ;;  %v24_v3 = vld [vmem:[%s531_s1 + $0x38] sm:$0xff]  ;;  %v23_v6 = vld [vmem:[%s531_s1 + $0x30] sm:$0xff]  ;;  %v22_v8 = vld [vmem:[%s531_s1 + $0x28] sm:$0xff] }
   0x4   :  { %80 = vmatpush.msra.mxu1 %v24_v3  ;;  %52 = vmatpush.msra.mxu0 %v281_v2  ;;  %v279_v9 = vld [vmem:[%s531_s1 + $0x60] sm:$0xff]  ;;  %v278_v12 = vld [vmem:[%s531_s1 + $0x58] sm:$0xff]  ;;  %v277_v15 = vld [vmem:[%s531_s1 + $0x50] sm:$0xff] }
   0x5   :  { %121 = vmatpush.msra.mxu2 %v374_v4  ;;  %181 = vmatpush.msra.mxu3 %v281_v2  ;;  %v397_v10 = vld [vmem:[%s531_s1 + $0xa0] sm:$0xff]  ;;  %v409_v13 = vld [vmem:[%s531_s1 + $0x98] sm:$0xff]  ;;  %v421_v16 = vld [vmem:[%s531_s1 + $0x90] sm:$0xff] }
   0x6   :  { %81 = vmatpush.msra.mxu1 %v23_v6  ;;  %53 = vmatpush.msra.mxu0 %v280_v5  ;;  %v21_v11 = vld [vmem:[%s531_s1 + $0x20] sm:$0xff]  ;;  %v20_v14 = vld [vmem:[%s531_s1 + $0x18] sm:$0xff]  ;;  %v19_v17 = vld [vmem:[%s531_s1 + $0x10] sm:$0xff] }
   0x7   :  { %122 = vmatpush.msra.mxu2 %v385_v7  ;;  %182 = vmatpush.msra.mxu3 %v280_v5  ;;  %v276_v18 = vld [vmem:[%s531_s1 + $0x48] sm:$0xff]  ;;  %v275_v21 = vld [vmem:[%s531_s1 + $0x40] sm:$0xff]  ;;  %v156_v27 = vld [vmem:[%s532_s0 + $0x13] sm:$0xff] }
   0x8   :  { %82 = vmatpush.msra.mxu1 %v22_v8  ;;  %54 = vmatpush.msra.mxu0 %v279_v9  ;;  %v433_v19 = vld [vmem:[%s531_s1 + $0x88] sm:$0xff]  ;;  %v445_v22 = vld [vmem:[%s531_s1 + $0x80] sm:$0xff]  ;;  %v146_v32 = vld [vmem:[%s532_s0 + $0x12] sm:$0xff] }
   0x9   :  { %123 = vmatpush.msra.mxu2 %v397_v10  ;;  %183 = vmatpush.msra.mxu3 %v279_v9  ;;  %v18_v20 = vld [vmem:[%s531_s1 + $0x8] sm:$0xff]  ;;  %v17_v25 = vld [vmem:[%s531_s1] sm:$0xff]  ;;  %v224_v34 = vld [vmem:[%s532_s0 + $0x14] sm:$0xff] }
   0xa   :  { %83 = vmatpush.msra.mxu1 %v21_v11  ;;  %55 = vmatpush.msra.mxu0 %v278_v12  ;;  %v25_v23 = vld [vmem:[%s532_s0 + $0x1] sm:$0xff]  ;;  %v26_v28 = vld [vmem:[%s532_s0 + $0x9] sm:$0xff]  ;;  %v335_v39 = vld [vmem:[%s533_s2] ss:$0 sm:$0xff] }
   0xb   :  { %124 = vmatpush.msra.mxu2 %v409_v13  ;;  %184 = vmatpush.msra.mxu3 %v278_v12  ;;  %v95_v24 = vld [vmem:[%s532_s0 + $0x2] sm:$0xff]  ;;  %v96_v29 = vld [vmem:[%s532_s0 + $0xa] sm:$0xff]  ;;  %v147_v33 = vld [vmem:[%s532_s0 + $0x1a] sm:$0xff] }
   0xc   :  { %84 = vmatpush.msra.mxu1 %v20_v14  ;;  %56 = vmatpush.msra.mxu0 %v277_v15  ;;  %v15_v26 = vld [vmem:[%s532_s0] sm:$0xff]  ;;  %v16_v30 = vld [vmem:[%s532_s0 + $0x8] sm:$0xff] }
   0xd   :  { %125 = vmatpush.msra.mxu2 %v421_v16  ;;  %185 = vmatpush.msra.mxu3 %v277_v15  ;;  %v157_v31 = vld [vmem:[%s532_s0 + $0x1b] sm:$0xff] }
   0xe   :  { %85 = vmatpush.msra.mxu1 %v19_v17  ;;  %57 = vmatpush.msra.mxu0 %v276_v18  ;;  %v225_v35 = vld [vmem:[%s532_s0 + $0x1c] sm:$0xff] }
   0xf   :  { %126 = vmatpush.msra.mxu2 %v433_v19  ;;  %186 = vmatpush.msra.mxu3 %v276_v18 }
  0x10   :  { %86 = vmatpush.msra.mxu1 %v18_v20  ;;  %58 = vmatpush.msra.mxu0 %v275_v21 }
  0x11   :  { %127 = vmatpush.msra.mxu2 %v445_v22  ;;  %283 = vmatmul.msk.f32.vlgmr.msra.gmra.mxu0 %vm36_vm0, %v25_v23 }
  0x12   :  { %295 = vmatmul.msk.f32.vlgmr.msra.gmra.mxu2 %vm36_vm0, %v95_v24  ;;  %87 = vmatpush.msra.mxu1 %v17_v25 }
  0x13   :  { %319 = vmatpush.msrb.mxu2 %v24_v3  ;;  %187 = vmatpush.msra.mxu3 %v275_v21 }
  0x14   :  { %209 = vmatpush.msrb.mxu0 %v24_v3  ;;  %285 = vmatmul.msk.f32.vlgmr.msra.gmra.mxu1 %vm36_vm0, %v15_v26 }
  0x15   :  { %305 = vmatmul.msk.f32.vlgmr.msra.gmra.mxu3 %vm36_vm0, %v156_v27  ;;  %320 = vmatpush.msrb.mxu2 %v23_v6 }
  0x16   :  { %327 = vmatpush.msrb.mxu3 %v362_v1  ;;  %210 = vmatpush.msrb.mxu0 %v23_v6 }
  0x17   :  { %248 = vmatpush.msrb.mxu1 %v362_v1  ;;  %321 = vmatpush.msrb.mxu2 %v22_v8 }
  0x18   :  { %328 = vmatpush.msrb.mxu3 %v374_v4  ;;  %211 = vmatpush.msrb.mxu0 %v22_v8 }
  0x19   :  { %249 = vmatpush.msrb.mxu1 %v374_v4  ;;  %322 = vmatpush.msrb.mxu2 %v21_v11 }
  0x1a   :  { %329 = vmatpush.msrb.mxu3 %v385_v7  ;;  %212 = vmatpush.msrb.mxu0 %v21_v11 }
  0x1b   :  { %250 = vmatpush.msrb.mxu1 %v385_v7  ;;  %284 = vmatmul.msk.f32.gmra.mxu0 %vm36_vm0, %v26_v28 }
  0x1c   :  { %296 = vmatmul.msk.f32.gmra.mxu2 %vm36_vm0, %v96_v29  ;;  %330 = vmatpush.msrb.mxu3 %v397_v10 }
  0x1d   :  { %323 = vmatpush.msrb.mxu2 %v20_v14  ;;  %213 = vmatpush.msrb.mxu0 %v20_v14 }
  0x1e   :  { %251 = vmatpush.msrb.mxu1 %v397_v10  ;;  %306 = vmatmul.msk.f32.gmra.mxu3 %vm36_vm0, %v157_v31 }
  0x1f   :  { %286 = vmatmul.msk.f32.gmra.mxu1 %vm36_vm0, %v16_v30  ;;  %324 = vmatpush.msrb.mxu2 %v19_v17 }
  0x20   :  { %331 = vmatpush.msrb.mxu3 %v409_v13  ;;  %214 = vmatpush.msrb.mxu0 %v19_v17 }
  0x21   :  { %252 = vmatpush.msrb.mxu1 %v409_v13  ;;  %325 = vmatpush.msrb.mxu2 %v18_v20 }
  0x22   :  { %332 = vmatpush.msrb.mxu3 %v421_v16  ;;  %215 = vmatpush.msrb.mxu0 %v18_v20 }
  0x23   :  { %253 = vmatpush.msrb.mxu1 %v421_v16  ;;  %326 = vmatpush.msrb.mxu2 %v17_v25 }
  0x24   :  { %333 = vmatpush.msrb.mxu3 %v433_v19  ;;  %216 = vmatpush.msrb.mxu0 %v17_v25 }
  0x25   :  { %254 = vmatpush.msrb.mxu1 %v433_v19  ;;  %307 = vmatmul.msk.f32.vlgmr.msrb.gmra.mxu0 %vm36_vm0, %v146_v32 }
  0x26   :  { %308 = vmatmul.msk.f32.vlgmr.msrb.gmra.mxu2 %vm36_vm0, %v147_v33  ;;  %334 = vmatpush.msrb.mxu3 %v445_v22 }
  0x27   :  { %255 = vmatpush.msrb.mxu1 %v445_v22  ;;  %318 = vmatmul.msk.f32.vlgmr.msrb.gmra.mxu3 %vm36_vm0, %v225_v35 }
  0x28   :  { %317 = vmatmul.msk.f32.vlgmr.msrb.gmra.mxu1 %vm36_vm0, %v224_v34 }
  0x8e   :  { %v60_v36 = vpop.f32.mrf.mxu0 }
  0x91   :  { %v89_v37 = vpop.f32.mrf.mxu1 }
  0x92   :  { %v90_v38 = vadd.f32 %v89_v37, %v60_v36 }
  0x95   :  { %v129_v40 = vpop.f32.mrf.mxu2 }
  0x96   :  { %v135_v41 = vadd.f32 %v129_v40, %v90_v38 }
  0x98   :  { %v140_v42 = vadd.f32 %v335_v39, %v135_v41  ;;  %v189_v43 = vpop.f32.mrf.mxu3  ;;  %v63_v44 = vpop.f32.mrf.mxu0 }
  0x9a   :  { %v142_v45 = vmax.f32 %v140_v42, 0.0 }
  0x9c   :  { %144 = vst [vmem:[%s534_s3] sm:$0xff] %v142_v45  ;;  %v92_v46 = vpop.f32.mrf.mxu1 }
  0x9d   :  { %v93_v47 = vadd.f32 %v92_v46, %v63_v44 }
  0x9f   :  { %v132_v48 = vpop.f32.mrf.mxu2 }
  0xa0   :  { %v136_v49 = vadd.f32 %v132_v48, %v93_v47 }
  0xa1   :  { %v192_v51 = vpop.f32.mrf.mxu3 }
  0xa2   :  { %v141_v50 = vadd.f32 %v335_v39, %v136_v49  ;;  %v218_v52 = vpop.f32.mrf.mxu0 }
  0xa3   :  { %v219_v54 = vadd.f32 %v218_v52, %v189_v43 }
  0xa4   :  { %v143_v53 = vmax.f32 %v141_v50, 0.0 }
  0xa5   :  { %v257_v55 = vpop.f32.mrf.mxu1 }
  0xa6   :  { %145 = vst [vmem:[%s534_s3 + $0x8] sm:$0xff] %v143_v53  ;;  %v263_v56 = vadd.f32 %v257_v55, %v219_v54 }
  0xa8   :  { %v265_v57 = vadd.f32 %v335_v39, %v263_v56 }
  0xa9   :  { %v221_v58 = vpop.f32.mrf.mxu2 }
  0xaa   :  { %v267_v59 = vmax.f32 %v265_v57, 0.0  ;;  %v222_v60 = vadd.f32 %v221_v58, %v192_v51  ;;  %v260_v61 = vpop.f32.mrf.mxu3 }
  0xac   :  { %269 = vst [vmem:[%s534_s3 + $0x10] sm:$0xff] %v267_v59  ;;  %v264_v62 = vadd.f32 %v260_v61, %v222_v60 }
  0xae   :  { %v266_v63 = vadd.f32 %v335_v39, %v264_v62 }
  0xb0   :  { %v268_v0 = vmax.f32 %v266_v63, 0.0 }
  0xb2   :  { %270 = vst [vmem:[%s534_s3 + $0x18] sm:$0xff] %v268_v0 }

</bundles_post_ra>
